<compile_context>
chip_gen: v5e
topology: v5e:2x2
jax: 0.10.0
libtpu: 0.0.40
codegen_flags: <defaults>
</compile_context>

<pallas_src>
import jax
import jax.numpy as jnp
from jax.experimental import pallas as pl
from jax.experimental.pallas import tpu as pltpu

BN_EPS = 1e-5


# --------------------------------------------------------------------------
# Kernel: one invocation, all regions fused.
# --------------------------------------------------------------------------
def _peripheral_kernel(x_ref, w_ref, b_ref, gb_ref, sel_ref, selt_ref, o_ref):
    # --- 1. All-region LSTM gates: ONE bf16 MXU pass, f32 accumulation. ---
    gates = jnp.dot(x_ref[...].astype(jnp.bfloat16), w_ref[...],
                    preferred_element_type=jnp.float32) + b_ref[...]

    n = o_ref.shape[-1]                       # n = R * output_size (lane-dense)
    # Packed column layout: [ I (n) | G (n) | O (n) ], region-major,
    # [fwd_H || bwd_H] within a region.  Forget gate dropped at pack time.
    i_act = jax.nn.sigmoid(gates[:, 0:n])
    g_act = jnp.tanh(gates[:, n:2 * n])
    o_act = jax.nn.sigmoid(gates[:, 2 * n:3 * n])
    # Seq-len-1 biLSTM, h0=c0=0:  h = sigmoid(o) * tanh(sigmoid(i) * tanh(g))
    h = o_act * jnp.tanh(i_act * g_act)       # [B, n] == concat(h_fwd, h_bwd)

    # --- 2. Fused BatchNorm1d (training), single-pass statistics. ---
    # var = E[h^2] - mean^2  -> ONE reduce matmul; gamma/beta folded into the
    # per-region scale/shift -> ONE broadcast matmul.  |h| < 1 (tanh/sigmoid
    # bounded) so the E[x^2]-mean^2 cancellation is harmless.
    # (These two small dots on f32 operands lower to the full-precision MXU
    # path in Mosaic; verified against the f32 reference.)
    num_regions = sel_ref.shape[-1]
    cnt = jnp.float32(h.shape[0] * (n // num_regions))

    colstats = jnp.concatenate(
        [jnp.sum(h, axis=0, keepdims=True),
         jnp.sum(h * h, axis=0, keepdims=True)], axis=0)              # [2, n]
    stats_r = jnp.dot(colstats, sel_ref[...],
                      preferred_element_type=jnp.float32) / cnt       # [2, R]
    mean_r = stats_r[0:1]                                             # [1, R]
    var_r = stats_r[1:2] - mean_r * mean_r                            # [1, R]
    scale_r = jax.lax.rsqrt(var_r + BN_EPS) * gb_ref[0:1]             # gamma folded
    shift_r = gb_ref[1:2] - mean_r * scale_r                          # beta folded
    coef = jnp.dot(jnp.concatenate([scale_r, shift_r], axis=0),
                   selt_ref[...], preferred_element_type=jnp.float32)  # [2, n]

    o_ref[...] = (h * coef[0:1] + coef[1:2]).astype(o_ref.dtype)


# --------------------------------------------------------------------------
# Wrapper: native layouts, free reshapes, single gridless pallas_call.
# --------------------------------------------------------------------------
def peripheral_feature_extractor(x, w_bd, b_all, gb, sel, sel_t):
    """x: [batch, regions, P]  ->  [batch, regions, output_size]"""
    B, R, P = x.shape
    n = w_bd.shape[-1] // 3                   # R * output_size
    out_size = n // R

    x_flat = x.reshape(B, R * P)              # contiguous reshape, no transpose

    vmem = pltpu.MemorySpace.VMEM
    y = pl.pallas_call(
        _peripheral_kernel,
        out_shape=jax.ShapeDtypeStruct((B, n), jnp.float32),
        in_specs=[pl.BlockSpec(memory_space=vmem)] * 6,
        out_specs=pl.BlockSpec(memory_space=vmem),
    )(x_flat, w_bd, b_all, gb, sel, sel_t)

    return y.reshape(B, R, out_size)          # contiguous reshape, no transpose


# --------------------------------------------------------------------------
# Parameter construction (PyTorch-style LSTM / BatchNorm1d init) and packing.
# --------------------------------------------------------------------------
def init_params(key, regions, peripheral_size, output_size):
    """Synthetic parameters matching nn.LSTM / nn.BatchNorm1d shapes & init."""
    H = output_size // 2
    k = 1.0 / jnp.sqrt(jnp.float32(H))
    k0, k1, k2 = jax.random.split(key, 3)
    # weight_ih per region & direction: [R, 2, 4H, P], gate row order i,f,g,o
    w_ih = jax.random.uniform(k0, (regions, 2, 4 * H, peripheral_size),
                              minval=-k, maxval=k, dtype=jnp.float32)
    b_ih = jax.random.uniform(k1, (regions, 2, 4 * H), minval=-k, maxval=k,
                              dtype=jnp.float32)
    b_hh = jax.random.uniform(k2, (regions, 2, 4 * H), minval=-k, maxval=k,
                              dtype=jnp.float32)
    # BatchNorm1d(num_features=regions): weight=1, bias=0 at init.
    gamma = jnp.ones((regions,), jnp.float32)
    beta = jnp.zeros((regions,), jnp.float32)
    return w_ih, b_ih, b_hh, gamma, beta


def pack_params(w_ih, b_ih, b_hh, gamma, beta):
    """Repack LSTM/BN params into the fused kernel layout (host-side, one-time).

    Returns:
      w_bd    [R*P, 3*R*out]  bf16 block-diagonal over regions; gate groups
                              I|G|O (forget gate dropped: it multiplies c0==0)
      b_all   [1, 3*R*out]    f32 fused bias_ih + bias_hh, same column order
      gb      [2, R]          f32 per-region BN gamma (row 0) / beta (row 1)
      sel     [R*out, R]      region indicator (lane -> region reduction)
      sel_t   [R, R*out]      its transpose (region -> lane broadcast)
    """
    R, _, fourH, P = w_ih.shape
    H = fourH // 4
    out = 2 * H
    n = R * out
    bias = b_ih + b_hh                                     # [R, 2, 4H]
    eye = jnp.eye(R, dtype=jnp.float32)

    def gate_w(g):
        # [R, 2, H, P] -> [R, P, 2H] (cols = [fwd | bwd]) -> block-diag [R*P, R*out]
        wg = w_ih[:, :, g * H:(g + 1) * H, :]
        wg = jnp.transpose(wg, (0, 3, 1, 2)).reshape(R, P, out)
        return jnp.einsum('rpc,rs->rpsc', wg, eye).reshape(R * P, n)

    def gate_b(g):
        return bias[:, :, g * H:(g + 1) * H].reshape(1, n)

    # Packed gate order: I | G | O  (PyTorch gate rows 0, 2, 3; forget dropped)
    w_bd = jnp.concatenate([gate_w(0), gate_w(2), gate_w(3)],
                           axis=-1).astype(jnp.bfloat16)      # bf16 storage
    b_all = jnp.concatenate([gate_b(0), gate_b(2), gate_b(3)],
                            axis=-1).astype(jnp.float32)      # tiny, keep f32

    gb = jnp.stack([gamma, beta], axis=0).astype(jnp.float32)            # [2, R]
    sel = jnp.kron(eye, jnp.ones((out, 1), jnp.float32))                 # [n, R]
    sel_t = jnp.transpose(sel)                                           # [R, n]
    return w_bd, b_all, gb, sel, sel_t


# --------------------------------------------------------------------------
# Pure-JAX reference (directly from the unpacked LSTM/BN params).
# --------------------------------------------------------------------------
def _reference(x, w_ih, b_ih, b_hh, gamma, beta):
    B, R, P = x.shape
    H = w_ih.shape[2] // 4
    bias = b_ih + b_hh                                               # [R, 2, 4H]
    gates = jnp.einsum('brp,rdgp->brdg', x, w_ih,
                       precision=jax.lax.Precision.HIGHEST) + bias[None]
    i = jax.nn.sigmoid(gates[..., 0 * H:1 * H])
    g = jnp.tanh(gates[..., 2 * H:3 * H])
    o = jax.nn.sigmoid(gates[..., 3 * H:4 * H])
    h = (o * jnp.tanh(i * g)).reshape(B, R, 2 * H)                   # concat(fwd, bwd)
    mean = h.mean(axis=(0, 2), keepdims=True)
    var = jnp.square(h - mean).mean(axis=(0, 2), keepdims=True)
    return (h - mean) / jnp.sqrt(var + BN_EPS) * gamma[None, :, None] + beta[None, :, None]


if __name__ == "__main__":
    batch = 16
    regions = 8
    peripheral_size = 16
    output_size = 32

    key = jax.random.PRNGKey(0)
    kx, kp = jax.random.split(key)
    x = jax.random.normal(kx, (batch, regions, peripheral_size), dtype=jnp.float32)

    w_ih, b_ih, b_hh, gamma, beta = init_params(kp, regions, peripheral_size, output_size)
    w_bd, b_all, gb, sel, sel_t = pack_params(w_ih, b_ih, b_hh, gamma, beta)

    out = peripheral_feature_extractor(x, w_bd, b_all, gb, sel, sel_t)
    out = jax.block_until_ready(out)

    # Reference with matching bf16 rounding applied to the MXU inputs only
    # (weights are stored bf16; x is cast bf16 in-kernel); everything else f32.
    x_q = x.astype(jnp.bfloat16).astype(jnp.float32)
    w_q = w_ih.astype(jnp.bfloat16).astype(jnp.float32)
    ref = jax.block_until_ready(_reference(x_q, w_q, b_ih, b_hh, gamma, beta))

    assert out.shape == (batch, regions, output_size), out.shape
    max_err = float(jnp.max(jnp.abs(out - ref)))
    assert jnp.allclose(out, ref, atol=2e-3, rtol=2e-3), max_err

    print("KERNEL_OK")
</pallas_src>

<mosaic_0001>
module attributes {stable_mosaic.version = 11 : i64} {
  func.func @_peripheral_kernel(%arg0: memref<16x128xf32, #tpu.memory_space<vmem>>, %arg1: memref<128x768xbf16, #tpu.memory_space<vmem>>, %arg2: memref<1x768xf32, #tpu.memory_space<vmem>>, %arg3: memref<2x8xf32, #tpu.memory_space<vmem>>, %arg4: memref<256x8xf32, #tpu.memory_space<vmem>>, %arg5: memref<8x256xf32, #tpu.memory_space<vmem>>, %arg6: memref<16x256xf32, #tpu.memory_space<vmem>>) attributes {dimension_semantics = [], scalar_prefetch = 0 : i64, scratch_operands = 0 : i64, tpu.core_type = #tpu.core_type<tc>} {
    %c0 = arith.constant 0 : index
    %c0_0 = arith.constant 0 : index
    %0 = vector.load %arg0[%c0, %c0_0] : memref<16x128xf32, #tpu.memory_space<vmem>>, vector<16x128xf32>
    %1 = arith.truncf %0 : vector<16x128xf32> to vector<16x128xbf16>
    %c0_1 = arith.constant 0 : index
    %c0_2 = arith.constant 0 : index
    %2 = vector.load %arg1[%c0_1, %c0_2] : memref<128x768xbf16, #tpu.memory_space<vmem>>, vector<128x768xbf16>
    %cst = arith.constant dense<0.000000e+00> : vector<16x768xf32>
    %3 = tpu.matmul %1, %2, %cst {dimension_numbers = #tpu.dot_dimension_numbers<[1], [0], [0], [1], [0, 0, 1, 1], [], []>} : vector<16x128xbf16>, vector<128x768xbf16>, vector<16x768xf32> -> vector<16x768xf32>
    %c0_3 = arith.constant 0 : index
    %c0_4 = arith.constant 0 : index
    %4 = vector.load %arg2[%c0_3, %c0_4] : memref<1x768xf32, #tpu.memory_space<vmem>>, vector<1x768xf32>
    %5 = vector.broadcast %4 : vector<1x768xf32> to vector<16x768xf32>
    %6 = arith.addf %3, %5 : vector<16x768xf32>
    %7 = vector.extract_strided_slice %6 {offsets = [0, 0], sizes = [16, 256], strides = [1, 1]} : vector<16x768xf32> to vector<16x256xf32>
    %8 = arith.negf %7 : vector<16x256xf32>
    %9 = math.exp %8 : vector<16x256xf32>
    %cst_5 = arith.constant 1.000000e+00 : f32
    %10 = vector.broadcast %cst_5 : f32 to vector<16x256xf32>
    %11 = arith.addf %10, %9 : vector<16x256xf32>
    %12 = arith.divf %10, %11 : vector<16x256xf32>
    %13 = vector.extract_strided_slice %6 {offsets = [0, 256], sizes = [16, 256], strides = [1, 1]} : vector<16x768xf32> to vector<16x256xf32>
    %14 = math.tanh %13 : vector<16x256xf32>
    %15 = vector.extract_strided_slice %6 {offsets = [0, 512], sizes = [16, 256], strides = [1, 1]} : vector<16x768xf32> to vector<16x256xf32>
    %16 = arith.negf %15 : vector<16x256xf32>
    %17 = math.exp %16 : vector<16x256xf32>
    %cst_6 = arith.constant 1.000000e+00 : f32
    %18 = vector.broadcast %cst_6 : f32 to vector<16x256xf32>
    %19 = arith.addf %18, %17 : vector<16x256xf32>
    %20 = arith.divf %18, %19 : vector<16x256xf32>
    %21 = arith.mulf %12, %14 : vector<16x256xf32>
    %22 = math.tanh %21 : vector<16x256xf32>
    %23 = arith.mulf %20, %22 : vector<16x256xf32>
    %cst_7 = arith.constant dense<0.000000e+00> : vector<256xf32>
    %24 = vector.multi_reduction <add>, %23, %cst_7 [0] : vector<16x256xf32> to vector<256xf32>
    %25 = vector.shape_cast %24 : vector<256xf32> to vector<1x256xf32>
    %26 = arith.mulf %23, %23 : vector<16x256xf32>
    %cst_8 = arith.constant dense<0.000000e+00> : vector<256xf32>
    %27 = vector.multi_reduction <add>, %26, %cst_8 [0] : vector<16x256xf32> to vector<256xf32>
    %28 = vector.shape_cast %27 : vector<256xf32> to vector<1x256xf32>
    %29 = tpu.concatenate %25, %28 in 0 : vector<1x256xf32>, vector<1x256xf32> -> vector<2x256xf32>
    %c0_9 = arith.constant 0 : index
    %c0_10 = arith.constant 0 : index
    %30 = vector.load %arg4[%c0_9, %c0_10] : memref<256x8xf32, #tpu.memory_space<vmem>>, vector<256x8xf32>
    %cst_11 = arith.constant dense<0.000000e+00> : vector<2x8xf32>
    %31 = tpu.matmul %29, %30, %cst_11 {dimension_numbers = #tpu.dot_dimension_numbers<[1], [0], [0], [1], [0, 0, 1, 1], [], []>} : vector<2x256xf32>, vector<256x8xf32>, vector<2x8xf32> -> vector<2x8xf32>
    %cst_12 = arith.constant 5.120000e+02 : f32
    %32 = vector.broadcast %cst_12 : f32 to vector<2x8xf32>
    %33 = arith.divf %31, %32 : vector<2x8xf32>
    %34 = vector.extract_strided_slice %33 {offsets = [0, 0], sizes = [1, 8], strides = [1, 1]} : vector<2x8xf32> to vector<1x8xf32>
    %35 = vector.extract_strided_slice %33 {offsets = [1, 0], sizes = [1, 8], strides = [1, 1]} : vector<2x8xf32> to vector<1x8xf32>
    %36 = arith.mulf %34, %34 : vector<1x8xf32>
    %37 = arith.subf %35, %36 : vector<1x8xf32>
    %cst_13 = arith.constant 9.99999974E-6 : f32
    %38 = vector.broadcast %cst_13 : f32 to vector<1x8xf32>
    %39 = arith.addf %37, %38 : vector<1x8xf32>
    %40 = math.rsqrt %39 : vector<1x8xf32>
    %c0_14 = arith.constant 0 : index
    %c0_15 = arith.constant 0 : index
    %41 = vector.load %arg3[%c0_14, %c0_15] : memref<2x8xf32, #tpu.memory_space<vmem>>, vector<1x8xf32>
    %42 = arith.mulf %40, %41 : vector<1x8xf32>
    %c1 = arith.constant 1 : index
    %c0_16 = arith.constant 0 : index
    %43 = vector.load %arg3[%c1, %c0_16] : memref<2x8xf32, #tpu.memory_space<vmem>>, vector<1x8xf32>
    %44 = arith.mulf %34, %42 : vector<1x8xf32>
    %45 = arith.subf %43, %44 : vector<1x8xf32>
    %46 = tpu.concatenate %42, %45 in 0 : vector<1x8xf32>, vector<1x8xf32> -> vector<2x8xf32>
    %c0_17 = arith.constant 0 : index
    %c0_18 = arith.constant 0 : index
    %47 = vector.load %arg5[%c0_17, %c0_18] : memref<8x256xf32, #tpu.memory_space<vmem>>, vector<8x256xf32>
    %cst_19 = arith.constant dense<0.000000e+00> : vector<2x256xf32>
    %48 = tpu.matmul %46, %47, %cst_19 {dimension_numbers = #tpu.dot_dimension_numbers<[1], [0], [0], [1], [0, 0, 1, 1], [], []>} : vector<2x8xf32>, vector<8x256xf32>, vector<2x256xf32> -> vector<2x256xf32>
    %49 = vector.extract_strided_slice %48 {offsets = [0, 0], sizes = [1, 256], strides = [1, 1]} : vector<2x256xf32> to vector<1x256xf32>
    %50 = vector.broadcast %49 : vector<1x256xf32> to vector<16x256xf32>
    %51 = arith.mulf %23, %50 : vector<16x256xf32>
    %52 = vector.extract_strided_slice %48 {offsets = [1, 0], sizes = [1, 256], strides = [1, 1]} : vector<2x256xf32> to vector<1x256xf32>
    %53 = vector.broadcast %52 : vector<1x256xf32> to vector<16x256xf32>
    %54 = arith.addf %51, %53 : vector<16x256xf32>
    %c0_20 = arith.constant 0 : index
    %c0_21 = arith.constant 0 : index
    %55 = vector.load %arg6[%c0_20, %c0_21] : memref<16x256xf32, #tpu.memory_space<vmem>>, vector<16x256xf32>
    tpu.vector_store %arg6[%c0_20, %c0_21], %54 {strides = array<i32>} : memref<16x256xf32, #tpu.memory_space<vmem>>, vector<16x256xf32>,
    return
  }
}

</mosaic_0001>

<bundles_post_ra>
// kernel: tpu_custom_call.1
= control target key start
LH: loop header
LB: loop body
LE: loop exit
PB: predicated region body
PF: predicated region fallthrough
CT: control target
= control target key end

     0   :  { %11 = vsyncpa [#allocation3], 0  ;;  %s1580_s0 = inlined_call_operand.vmem [shape: f32[16,128], index: 0, kind: input, shape index: {}]   ;;  %s1581_s1 = inlined_call_operand.hbm [shape: bf16[128,768], index: 1, kind: input, shape index: {}]   ;;  %s1582_s2 = inlined_call_operand.vmem [shape: f32[1,768], index: 2, kind: input, shape index: {}]   ;;  %s1583_s3 = inlined_call_operand.vmem [shape: f32[2,8], index: 3, kind: input, shape index: {}]   ;;  %s1584_s4 = inlined_call_operand.vmem [shape: f32[256,8], index: 4, kind: input, shape index: {}]   ;;  %s1585_s5 = inlined_call_operand.vmem [shape: f32[8,256], index: 5, kind: input, shape index: {}]   ;;  %s1586_s6 = inlined_call_operand.hbm [shape: f32[16,256], index: 6, kind: output, shape index: {}]  }
   0x1   :  { %12 = vsyncpa [#allocation4], 0  ;;  %s19_s23 = sshll.u32 %s1581_s1, 4  ;;  %s1185_s24 = smov [#allocation2]   ;;  %s20_s23 = int_to_ptr.hbm [resolvable:$true] %s19_s23 }
   0x2   :  { %s21_s25 = sshll.u32 %s1185_s24, 4  ;;  %s1186_s26 = smov 384   ;;  %s22_s25 = int_to_ptr.vmem [resolvable:$true] %s21_s25 }
   0x3   :  { %s1187_s27 = smov 24  }
   0x4   :  { %27 = dma.hbm_to_vmem [thread:$0]  %s20_s23, 6144, %s22_s25, [#allocation3], %s1186_s26, %s1186_s26, %s1187_s27  }
   0x5   :  { %1181 = dma.done.wait [#allocation3], 6144  }
   0x6   :  { %1182 = vsyncadd [#allocation3], 4294961152  ;;  %v994_v0 = vld [vmem:[#allocation2 + $0x150] sm:$0xf]  ;;  %v1071_v1 = vld [vmem:[#allocation2 + $0x164] sm:$0xf0] }
   0x7   :  { %v1068_v2 = vld [vmem:[#allocation2 + $0x154] sm:$0xf]  ;;  %v995_v3 = vor.u32 %v1071_v1, %v994_v0  ;;  %v996_v4 = vld [vmem:[#allocation2 + $0x168] sm:$0xf0]  ;;  %v970_v5 = vld [vmem:[#allocation2 + $0x120] sm:$0xf] }
   0x8   :  { %v1065_v6 = vld [vmem:[#allocation2 + $0x134] sm:$0xf0]  ;;  %v999_v7 = vor.u32 %v1068_v2, %v996_v4  ;;  %v1062_v8 = vld [vmem:[#allocation2 + $0x124] sm:$0xf]  ;;  %v972_v9 = vld [vmem:[#allocation2 + $0x138] sm:$0xf0] }
   0x9   :  { %345 = vmatpush.bf16.msra.mxu0 %v995_v3  ;;  %v971_v10 = vor.u32 %v1065_v6, %v970_v5  ;;  %v975_v11 = vor.u32 %v1062_v8, %v972_v9  ;;  %v946_v12 = vld [vmem:[#allocation2 + $0xf0] sm:$0xf]  ;;  %v1059_v13 = vld [vmem:[#allocation2 + $0x104] sm:$0xf0]  ;;  %v1056_v14 = vld [vmem:[#allocation2 + $0xf4] sm:$0xf] }
   0xa   :  { %359 = vmatpush.bf16.msra.mxu1 %v999_v7  ;;  %v948_v15 = vld [vmem:[#allocation2 + $0x108] sm:$0xf0]  ;;  %v1002_v16 = vld [vmem:[#allocation2 + $0x158] sm:$0xf]  ;;  %v1072_v17 = vld [vmem:[#allocation2 + $0x16c] sm:$0xf0]  ;;  %v947_v21 = vor.u32 %v1059_v13, %v946_v12 }
   0xb   :  { %v1003_v18 = vor.u32 %v1072_v17, %v1002_v16  ;;  %v1069_v19 = vld [vmem:[#allocation2 + $0x15c] sm:$0xf]  ;;  %v1004_v20 = vld [vmem:[#allocation2 + $0x170] sm:$0xf0]  ;;  %v922_v22 = vld [vmem:[#allocation2 + $0xc0] sm:$0xf]  ;;  %v951_v25 = vor.u32 %v1056_v14, %v948_v15 }
   0xc   :  { %v1053_v23 = vld [vmem:[#allocation2 + $0xd4] sm:$0xf0]  ;;  %v1007_v24 = vor.u32 %v1069_v19, %v1004_v20  ;;  %v978_v26 = vld [vmem:[#allocation2 + $0x128] sm:$0xf]  ;;  %v1066_v27 = vld [vmem:[#allocation2 + $0x13c] sm:$0xf0] }
   0xd   :  { %346 = vmatpush.bf16.msra.mxu0 %v971_v10  ;;  %373 = vmatpush.bf16.msra.mxu2 %v1003_v18  ;;  %v1063_v28 = vld [vmem:[#allocation2 + $0x12c] sm:$0xf]  ;;  %v1050_v29 = vld [vmem:[#allocation2 + $0xc4] sm:$0xf]  ;;  %v924_v30 = vld [vmem:[#allocation2 + $0xd8] sm:$0xf0]  ;;  %v979_v31 = vor.u32 %v1066_v27, %v978_v26  ;;  %v923_v35 = vor.u32 %v1053_v23, %v922_v22 }
   0xe   :  { %360 = vmatpush.bf16.msra.mxu1 %v975_v11  ;;  %387 = vmatpush.bf16.msra.mxu3 %v1007_v24  ;;  %v980_v32 = vld [vmem:[#allocation2 + $0x140] sm:$0xf0]  ;;  %v954_v34 = vld [vmem:[#allocation2 + $0xf8] sm:$0xf]  ;;  %v1060_v36 = vld [vmem:[#allocation2 + $0x10c] sm:$0xf0]  ;;  %v927_v39 = vor.u32 %v1050_v29, %v924_v30 }
   0xf   :  { %v983_v33 = vor.u32 %v1063_v28, %v980_v32  ;;  %v1057_v37 = vld [vmem:[#allocation2 + $0xfc] sm:$0xf]  ;;  %v956_v38 = vld [vmem:[#allocation2 + $0x110] sm:$0xf0]  ;;  %v898_v40 = vld [vmem:[#allocation2 + $0x90] sm:$0xf]  ;;  %v955_v43 = vor.u32 %v1060_v36, %v954_v34 }
  0x10   :  { %v1047_v41 = vld [vmem:[#allocation2 + $0xa4] sm:$0xf0]  ;;  %v1044_v42 = vld [vmem:[#allocation2 + $0x94] sm:$0xf]  ;;  %v900_v44 = vld [vmem:[#allocation2 + $0xa8] sm:$0xf0]  ;;  %v959_v45 = vor.u32 %v1057_v37, %v956_v38 }
  0x11   :  { %347 = vmatpush.bf16.msra.mxu0 %v947_v21  ;;  %374 = vmatpush.bf16.msra.mxu2 %v979_v31  ;;  %v930_v46 = vld [vmem:[#allocation2 + $0xc8] sm:$0xf]  ;;  %v1054_v47 = vld [vmem:[#allocation2 + $0xdc] sm:$0xf0]  ;;  %v1051_v48 = vld [vmem:[#allocation2 + $0xcc] sm:$0xf]  ;;  %v899_v50 = vor.u32 %v1047_v41, %v898_v40  ;;  %v903_v51 = vor.u32 %v1044_v42, %v900_v44 }
  0x12   :  { %361 = vmatpush.bf16.msra.mxu1 %v951_v25  ;;  %388 = vmatpush.bf16.msra.mxu3 %v983_v33  ;;  %v932_v49 = vld [vmem:[#allocation2 + $0xe0] sm:$0xf0]  ;;  %v874_v52 = vld [vmem:[#allocation2 + $0x60] sm:$0xf]  ;;  %v1041_v53 = vld [vmem:[#allocation2 + $0x74] sm:$0xf0]  ;;  %v931_v54 = vor.u32 %v1054_v47, %v930_v46 }
  0x13   :  { %v1038_v55 = vld [vmem:[#allocation2 + $0x64] sm:$0xf]  ;;  %v876_v56 = vld [vmem:[#allocation2 + $0x78] sm:$0xf0]  ;;  %v935_v57 = vor.u32 %v1051_v48, %v932_v49  ;;  %v906_v58 = vld [vmem:[#allocation2 + $0x98] sm:$0xf]  ;;  %v875_v61 = vor.u32 %v1041_v53, %v874_v52 }
  0x14   :  { %v1048_v59 = vld [vmem:[#allocation2 + $0xac] sm:$0xf0]  ;;  %v1045_v60 = vld [vmem:[#allocation2 + $0x9c] sm:$0xf]  ;;  %v908_v62 = vld [vmem:[#allocation2 + $0xb0] sm:$0xf0]  ;;  %v879_v63 = vor.u32 %v1038_v55, %v876_v56 }
  0x15   :  { %348 = vmatpush.bf16.msra.mxu0 %v923_v35  ;;  %375 = vmatpush.bf16.msra.mxu2 %v955_v43  ;;  %v850_v0 = vld [vmem:[#allocation2 + $0x30] sm:$0xf]  ;;  %v1035_v1 = vld [vmem:[#allocation2 + $0x44] sm:$0xf0]  ;;  %v1032_v2 = vld [vmem:[#allocation2 + $0x34] sm:$0xf]  ;;  %v907_v3 = vor.u32 %v1048_v59, %v906_v58  ;;  %v911_v5 = vor.u32 %v1045_v60, %v908_v62 }
  0x16   :  { %362 = vmatpush.bf16.msra.mxu1 %v927_v39  ;;  %389 = vmatpush.bf16.msra.mxu3 %v959_v45  ;;  %v852_v4 = vld [vmem:[#allocation2 + $0x48] sm:$0xf0]  ;;  %v882_v6 = vld [vmem:[#allocation2 + $0x68] sm:$0xf]  ;;  %v1042_v7 = vld [vmem:[#allocation2 + $0x7c] sm:$0xf0]  ;;  %v851_v10 = vor.u32 %v1035_v1, %v850_v0 }
  0x17   :  { %v1039_v8 = vld [vmem:[#allocation2 + $0x6c] sm:$0xf]  ;;  %v884_v9 = vld [vmem:[#allocation2 + $0x80] sm:$0xf0]  ;;  %v826_v11 = vld [vmem:[#allocation2] sm:$0xf]  ;;  %v855_v13 = vor.u32 %v1032_v2, %v852_v4  ;;  %v883_v17 = vor.u32 %v1042_v7, %v882_v6 }
  0x18   :  { %v1029_v12 = vld [vmem:[#allocation2 + $0x14] sm:$0xf0]  ;;  %v1026_v14 = vld [vmem:[#allocation2 + $0x4] sm:$0xf]  ;;  %v828_v15 = vld [vmem:[#allocation2 + $0x18] sm:$0xf0]  ;;  %v887_v21 = vor.u32 %v1039_v8, %v884_v9 }
  0x19   :  { %349 = vmatpush.bf16.msra.mxu0 %v899_v50  ;;  %376 = vmatpush.bf16.msra.mxu2 %v931_v54  ;;  %v1010_v16 = vld [vmem:[#allocation2 + $0x160] sm:$0xf]  ;;  %v1073_v18 = vld [vmem:[#allocation2 + $0x174] sm:$0xf0]  ;;  %v1070_v19 = vld [vmem:[#allocation2 + $0x164] sm:$0xf]  ;;  %v827_v25 = vor.u32 %v1029_v12, %v826_v11  ;;  %v831_v29 = vor.u32 %v1026_v14, %v828_v15 }
  0x1a   :  { %363 = vmatpush.bf16.msra.mxu1 %v903_v51  ;;  %390 = vmatpush.bf16.msra.mxu3 %v935_v57  ;;  %v1012_v20 = vld [vmem:[#allocation2 + $0x178] sm:$0xf0]  ;;  %v40_v22 = vld [vmem:[%s1580_s0] sm:$0xff]  ;;  %v858_v23 = vld [vmem:[#allocation2 + $0x38] sm:$0xf]  ;;  %v1011_v30 = vor.u32 %v1073_v18, %v1010_v16  ;;  %s811_s26 = sshll.u32 %s1586_s6, 4  ;;  %s812_s26 = int_to_ptr.hbm [resolvable:$true] %s811_s26 }
  0x1b   :  { %v1036_v24 = vld [vmem:[#allocation2 + $0x4c] sm:$0xf0]  ;;  %v41_v26 = vld [vmem:[%s1580_s0 + $0x8] sm:$0xff]  ;;  %v1033_v27 = vld [vmem:[#allocation2 + $0x3c] sm:$0xf]  ;;  %v1015_v31 = vor.u32 %v1070_v19, %v1012_v20  ;;  %s1190_s27 = smov 256  }
  0x1c   :  { %v860_v28 = vld [vmem:[#allocation2 + $0x50] sm:$0xf0]  ;;  %v986_v32 = vld [vmem:[#allocation2 + $0x130] sm:$0xf]  ;;  %v1067_v33 = vld [vmem:[#allocation2 + $0x144] sm:$0xf0]  ;;  %v859_v35 = vor.u32 %v1036_v24, %v858_v23  ;;  %v1236_v36 = vpack.c.bf16 %v41_v26, %v40_v22 }
  0x1d   :  { %350 = vmatpush.bf16.msra.mxu0 %v875_v61  ;;  %377 = vmatpush.bf16.msra.mxu2 %v907_v3  ;;  %v1064_v34 = vld [vmem:[#allocation2 + $0x134] sm:$0xf]  ;;  %v988_v37 = vld [vmem:[#allocation2 + $0x148] sm:$0xf0]  ;;  %v863_v38 = vor.u32 %v1033_v27, %v860_v28  ;;  %v834_v39 = vld [vmem:[#allocation2 + $0x8] sm:$0xf]  ;;  %v987_v43 = vor.u32 %v1067_v33, %v986_v32 }
  0x1e   :  { %364 = vmatpush.bf16.msra.mxu1 %v879_v63  ;;  %391 = vmatpush.bf16.msra.mxu3 %v911_v5  ;;  %v1030_v40 = vld [vmem:[#allocation2 + $0x1c] sm:$0xf0]  ;;  %v1027_v41 = vld [vmem:[#allocation2 + $0xc] sm:$0xf]  ;;  %v836_v42 = vld [vmem:[#allocation2 + $0x20] sm:$0xf0]  ;;  %v991_v44 = vor.u32 %v1064_v34, %v988_v37 }
  0x1f   :  { %v962_v45 = vld [vmem:[#allocation2 + $0x100] sm:$0xf]  ;;  %v1061_v46 = vld [vmem:[#allocation2 + $0x114] sm:$0xf0]  ;;  %v835_v47 = vor.u32 %v1030_v40, %v834_v39  ;;  %v1058_v48 = vld [vmem:[#allocation2 + $0x104] sm:$0xf]  ;;  %v839_v50 = vor.u32 %v1027_v41, %v836_v42 }
  0x20   :  { %v964_v49 = vld [vmem:[#allocation2 + $0x118] sm:$0xf0]  ;;  %v963_v51 = vor.u32 %v1061_v46, %v962_v45  ;;  %v938_v53 = vld [vmem:[#allocation2 + $0xd0] sm:$0xf]  ;;  %v1055_v54 = vld [vmem:[#allocation2 + $0xe4] sm:$0xf0] }
  0x21   :  { %351 = vmatpush.bf16.msra.mxu0 %v851_v10  ;;  %378 = vmatpush.bf16.msra.mxu2 %v883_v17  ;;  %v967_v52 = vor.u32 %v1058_v48, %v964_v49  ;;  %v1052_v55 = vld [vmem:[#allocation2 + $0xd4] sm:$0xf]  ;;  %v940_v56 = vld [vmem:[#allocation2 + $0xe8] sm:$0xf0]  ;;  %v939_v57 = vor.u32 %v1055_v54, %v938_v53  ;;  %v914_v59 = vld [vmem:[#allocation2 + $0xa0] sm:$0xf] }
  0x22   :  { %365 = vmatpush.bf16.msra.mxu1 %v855_v13  ;;  %392 = vmatpush.bf16.msra.mxu3 %v887_v21  ;;  %v943_v58 = vor.u32 %v1052_v55, %v940_v56  ;;  %v1049_v60 = vld [vmem:[#allocation2 + $0xb4] sm:$0xf0]  ;;  %v1046_v61 = vld [vmem:[#allocation2 + $0xa4] sm:$0xf]  ;;  %v916_v62 = vld [vmem:[#allocation2 + $0xb8] sm:$0xf0] }
  0x23   :  { %v915_v63 = vor.u32 %v1049_v60, %v914_v59  ;;  %v919_v0 = vor.u32 %v1046_v61, %v916_v62  ;;  %v890_v1 = vld [vmem:[#allocation2 + $0x70] sm:$0xf]  ;;  %v1043_v2 = vld [vmem:[#allocation2 + $0x84] sm:$0xf0]  ;;  %v1040_v3 = vld [vmem:[#allocation2 + $0x74] sm:$0xf] }
  0x24   :  { %v892_v4 = vld [vmem:[#allocation2 + $0x88] sm:$0xf0]  ;;  %v891_v5 = vor.u32 %v1043_v2, %v890_v1  ;;  %v866_v7 = vld [vmem:[#allocation2 + $0x40] sm:$0xf]  ;;  %v1037_v8 = vld [vmem:[#allocation2 + $0x54] sm:$0xf0] }
  0x25   :  { %352 = vmatpush.bf16.msra.mxu0 %v827_v25  ;;  %379 = vmatpush.bf16.msra.mxu2 %v859_v35  ;;  %v895_v6 = vor.u32 %v1040_v3, %v892_v4  ;;  %v1034_v9 = vld [vmem:[#allocation2 + $0x44] sm:$0xf]  ;;  %v868_v10 = vld [vmem:[#allocation2 + $0x58] sm:$0xf0]  ;;  %v867_v11 = vor.u32 %v1037_v8, %v866_v7  ;;  %v842_v13 = vld [vmem:[#allocation2 + $0x10] sm:$0xf] }
  0x26   :  { %366 = vmatpush.bf16.msra.mxu1 %v831_v29  ;;  %393 = vmatpush.bf16.msra.mxu3 %v863_v38  ;;  %v871_v12 = vor.u32 %v1034_v9, %v868_v10  ;;  %v1031_v14 = vld [vmem:[#allocation2 + $0x24] sm:$0xf0]  ;;  %v1028_v15 = vld [vmem:[#allocation2 + $0x14] sm:$0xf]  ;;  %v844_v16 = vld [vmem:[#allocation2 + $0x28] sm:$0xf0] }
  0x27   :  { %v843_v17 = vor.u32 %v1031_v14, %v842_v13  ;;  %v847_v18 = vor.u32 %v1028_v15, %v844_v16  ;;  %v1247_v19 = vld [vmem:[%s1582_s2] sm:$0x3f]  ;;  %v647_v46 = vld [vmem:[%s1584_s4 + $0x78] sm:$0xff]  ;;  %v662_v53 = vld [vmem:[%s1584_s4 + $0xf0] sm:$0xff]  ;;  %s1191_s1 = smov 16  }
  0x28   :  { %353 = vmatmul.bf16.vlgmr.msra.gmra.mxu0 %v1236_v36  ;;  %v93_v20 = vperm.slane %v1247_v19, 0  ;;  %v94_v21 = vperm.slane %v1247_v19, 1  ;;  %v97_v45 = vperm.slane %v1247_v19, 4  ;;  %v98_v49 = vperm.slane %v1247_v19, 5  ;;  %v645_v59 = vld [vmem:[%s1584_s4 + $0x68] sm:$0xff]  ;;  %v643_v13 = vld [vmem:[%s1584_s4 + $0x58] sm:$0xff] }
  0x29   :  { %401 = vmatpush.bf16.msrb.mxu0 %v1011_v30  ;;  %367 = vmatmul.bf16.vlgmr.msra.gmra.mxu1 %v1236_v36  ;;  %v95_v56 = vperm.slane %v1247_v19, 2  ;;  %v661_v60 = vld [vmem:[%s1584_s4 + $0xe8] sm:$0xff]  ;;  %v659_v14 = vld [vmem:[%s1584_s4 + $0xd8] sm:$0xff] }
  0x2a   :  { %415 = vmatpush.bf16.msrb.mxu1 %v1015_v31  ;;  %380 = vmatpush.bf16.msra.mxu2 %v835_v47  ;;  %v663_v47 = vld [vmem:[%s1584_s4 + $0xf8] sm:$0xff] }
  0x2b   :  { %394 = vmatpush.bf16.msra.mxu3 %v839_v50 }
  0x2d   :  { %402 = vmatpush.bf16.msrb.mxu0 %v987_v43  ;;  %381 = vmatmul.bf16.vlgmr.msra.gmra.mxu2 %v1236_v36 }
  0x2e   :  { %416 = vmatpush.bf16.msrb.mxu1 %v991_v44  ;;  %395 = vmatmul.bf16.vlgmr.msra.gmra.mxu3 %v1236_v36 }
  0x2f   :  { %664 = vmatpush.msrb.mxu2 %v647_v46  ;;  %684 = vmatpush.msrb.mxu3 %v663_v47 }
  0x31   :  { %403 = vmatpush.bf16.msrb.mxu0 %v963_v51  ;;  %685 = vmatpush.msrb.mxu3 %v662_v53 }
  0x32   :  { %417 = vmatpush.bf16.msrb.mxu1 %v967_v52  ;;  %v646_v52 = vld [vmem:[%s1584_s4 + $0x70] sm:$0xff] }
  0x33   :  { %665 = vmatpush.msrb.mxu2 %v646_v52  ;;  %686 = vmatpush.msrb.mxu3 %v661_v60 }
  0x35   :  { %404 = vmatpush.bf16.msrb.mxu0 %v939_v57  ;;  %666 = vmatpush.msrb.mxu2 %v645_v59  ;;  %v654_v59 = vld [vmem:[%s1584_s4 + $0xb0] sm:$0xff] }
  0x36   :  { %418 = vmatpush.bf16.msrb.mxu1 %v943_v58 }
  0x39   :  { %405 = vmatpush.bf16.msrb.mxu0 %v915_v63 }
  0x3a   :  { %419 = vmatpush.bf16.msrb.mxu1 %v919_v0  ;;  %v96_v0 = vperm.slane %v1247_v19, 3 }
  0x3d   :  { %406 = vmatpush.bf16.msrb.mxu0 %v891_v5  ;;  %v644_v5 = vld [vmem:[%s1584_s4 + $0x60] sm:$0xff] }
  0x3e   :  { %420 = vmatpush.bf16.msrb.mxu1 %v895_v6  ;;  %v660_v6 = vld [vmem:[%s1584_s4 + $0xe0] sm:$0xff]  ;;  %667 = vmatpush.msrb.mxu2 %v644_v5 }
  0x3f   :  { %687 = vmatpush.msrb.mxu3 %v660_v6 }
  0x40   :  { %668 = vmatpush.msrb.mxu2 %v643_v13 }
  0x41   :  { %407 = vmatpush.bf16.msrb.mxu0 %v867_v11  ;;  %688 = vmatpush.msrb.mxu3 %v659_v14 }
  0x42   :  { %421 = vmatpush.bf16.msrb.mxu1 %v871_v12 }
  0x45   :  { %408 = vmatpush.bf16.msrb.mxu0 %v843_v17  ;;  %v642_v17 = vld [vmem:[%s1584_s4 + $0x50] sm:$0xff] }
  0x46   :  { %422 = vmatpush.bf16.msrb.mxu1 %v847_v18  ;;  %v658_v18 = vld [vmem:[%s1584_s4 + $0xd0] sm:$0xff]  ;;  %669 = vmatpush.msrb.mxu2 %v642_v17 }
  0x47   :  { %689 = vmatpush.msrb.mxu3 %v658_v18 }
  0x48   :  { %409 = vmatmul.bf16.vlgmr.msrb.gmra.mxu0 %v1236_v36 }
  0x49   :  { %423 = vmatmul.bf16.vlgmr.msrb.gmra.mxu1 %v1236_v36 }
  0xa5   :  { %v354_v22 = vpop.f32.mrf.mxu0 }
  0xa6   :  { %v355_v23 = vadd.f32 %v354_v22, %v93_v20  ;;  %v368_v24 = vpop.f32.mrf.mxu1 }
  0xa7   :  { %v369_v25 = vadd.f32 %v368_v24, %v94_v21  ;;  %v657_v24 = vld [vmem:[%s1584_s4 + $0xc8] sm:$0xff] }
  0xa8   :  { %v1016_v26 = vmul.f32 -1.442695, %v355_v23  ;;  %v641_v23 = vld [vmem:[%s1584_s4 + $0x48] sm:$0xff]  ;;  %690 = vmatpush.msrb.mxu3 %v657_v24  ;;  %v650_v24 = vld [vmem:[%s1584_s4 + $0x90] sm:$0xff] }
  0xa9   :  { %v1017_v27 = vmul.f32 -1.442695, %v369_v25  ;;  %670 = vmatpush.msrb.mxu2 %v641_v23  ;;  %v634_v23 = vld [vmem:[%s1584_s4 + $0x10] sm:$0xff] }
  0xaa   :  { %1081 = vpow2.f32 %v1016_v26 }
  0xab   :  { %1083 = vpow2.f32 %v1017_v27 }
  0xad   :  { %v356_v28 = vpop.f32.mrf.mxu0 }
  0xae   :  { %v357_v29 = vadd.f32 %v356_v28, %v93_v20  ;;  %v370_v30 = vpop.f32.mrf.mxu1 }
  0xaf   :  { %v371_v31 = vadd.f32 %v370_v30, %v94_v21 }
  0xb0   :  { %v1018_v32 = vmul.f32 -1.442695, %v357_v29  ;;  %v1082_v33 = vpop.eup %1081  ;;  %v382_v42 = vpop.f32.mrf.mxu2 }
  0xb1   :  { %v1019_v34 = vmul.f32 -1.442695, %v371_v31  ;;  %v1084_v35 = vpop.eup %1083  ;;  %v1251_v36 = vadd.f32 1.0, %v1082_v33  ;;  %v396_v48 = vpop.f32.mrf.mxu3  ;;  %v383_v10 = vadd.f32 %v382_v42, %v95_v56  ;;  %v649_v31 = vld [vmem:[%s1584_s4 + $0x88] sm:$0xff] }
  0xb2   :  { %1085 = vpow2.f32 %v1018_v32  ;;  %v1253_v37 = vadd.f32 1.0, %v1084_v35  ;;  %v397_v16 = vadd.f32 %v396_v48, %v96_v0  ;;  %v656_v35 = vld [vmem:[%s1584_s4 + $0xc0] sm:$0xff]  ;;  %v639_v48 = vld [vmem:[%s1584_s4 + $0x38] sm:$0xff] }
  0xb3   :  { %1087 = vpow2.f32 %v1019_v34  ;;  %v454_v63 = vand.u32 2147483647, %v1251_v36  ;;  %v456_v8 = vand.u32 2147483648, %v1251_v36  ;;  %vm450_vm0 = vweird.f32 %v1251_v36  ;;  %v640_v34 = vld [vmem:[%s1584_s4 + $0x40] sm:$0xff]  ;;  %691 = vmatpush.msrb.mxu3 %v656_v35 }
  0xb4   :  { %1089 = vrcp.f32 %v1251_v36  ;;  %v469_v11 = vand.u32 2147483647, %v1253_v37  ;;  %vm465_vm1 = vweird.f32 %v1253_v37  ;;  %v471_v27 = vand.u32 2147483648, %v1253_v37  ;;  %671 = vmatpush.msrb.mxu2 %v640_v34 }
  0xb5   :  { %1091 = vrcp.f32 %v1253_v37  ;;  %vm1329_vm2 = vcmp.eq.f32.partialorder %v454_v63, 8.507059e+37  ;;  %v1339_v25 = vor.u32 1.1754944e-38, %v456_v8  ;;  %v652_v8 = vld [vmem:[%s1584_s4 + $0xa0] sm:$0xff] }
  0xb6   :  { %vm1344_vm4 = vcmp.eq.f32.partialorder %v469_v11, 8.507059e+37  ;;  %v472_v53 = vor.u32 1.1754944e-38, %v471_v27  ;;  %672 = vmatpush.msrb.mxu2 %v639_v48 }
  0xb8   :  { %v1086_v38 = vpop.eup %1085  ;;  %v384_v12 = vpop.f32.mrf.mxu2 }
  0xb9   :  { %v1257_v39 = vadd.f32 1.0, %v1086_v38  ;;  %v1088_v40 = vpop.eup %1087  ;;  %v385_v28 = vadd.f32 %v384_v12, %v95_v56  ;;  %v398_v29 = vpop.f32.mrf.mxu3 }
  0xba   :  { %v1260_v41 = vadd.f32 1.0, %v1088_v40  ;;  %v1262_v43 = vpop.eup %1089 }
  0xbb   :  { %1093 = vrcp.f32 %v1257_v39  ;;  %v1265_v44 = vpop.eup %1091  ;;  %v446_v51 = vmul.f32 %v1262_v43, %v1251_v36  ;;  %vm451_vm3 = vweird.f32 %v1262_v43  ;;  %vm480_vm8 = vweird.f32 %v1257_v39 }
  0xbc   :  { %1095 = vrcp.f32 %v1260_v41  ;;  %v461_v54 = vmul.f32 %v1265_v44, %v1253_v37  ;;  %vm466_vm5 = vweird.f32 %v1265_v44  ;;  %vm1372_vm6 = vmor %vm450_vm0, %vm451_vm3  ;;  %v486_v36 = vand.u32 2147483648, %v1257_v39 }
  0xbd   :  { %v447_v2 = vsub.f32 1.0, %v446_v51  ;;  %v655_v51 = vld [vmem:[%s1584_s4 + $0xb8] sm:$0xff]  ;;  %vm1381_vm7 = vmor %vm465_vm1, %vm466_vm5  ;;  %v501_v5 = vand.u32 2147483648, %v1260_v41  ;;  %vm495_vm12 = vweird.f32 %v1260_v41 }
  0xbe   :  { %v462_v7 = vsub.f32 1.0, %v461_v54  ;;  %692 = vmatpush.msrb.mxu3 %v655_v51  ;;  %v487_v13 = vor.u32 1.1754944e-38, %v486_v36 }
  0xbf   :  { %v448_v21 = vmul.f32 %v1262_v43, %v447_v2  ;;  %v653_v2 = vld [vmem:[%s1584_s4 + $0xa8] sm:$0xff]  ;;  %v502_v17 = vor.u32 1.1754944e-38, %v501_v5 }
  0xc0   :  { %v463_v26 = vmul.f32 %v1265_v44, %v462_v7  ;;  %693 = vmatpush.msrb.mxu3 %v654_v59  ;;  %v636_v7 = vld [vmem:[%s1584_s4 + $0x20] sm:$0xff] }
  0xc1   :  { %v1275_v50 = vpop.eup %1093  ;;  %v449_v42 = vadd.f32 %v1262_v43, %v448_v21 }
  0xc2   :  { %v1296_v61 = vpop.eup %1095  ;;  %v476_v62 = vmul.f32 %v1275_v50, %v1257_v39  ;;  %vm481_vm9 = vweird.f32 %v1275_v50  ;;  %694 = vmatpush.msrb.mxu3 %v653_v2 }
  0xc3   :  { %v491_v3 = vmul.f32 %v1296_v61, %v1260_v41  ;;  %v453_v63 = vsel %vm1372_vm6, %v1262_v43, %v449_v42  ;;  %vm496_vm10 = vweird.f32 %v1296_v61  ;;  %v484_v43 = vand.u32 2147483647, %v1257_v39  ;;  %vm1420_vm11 = vmor %vm480_vm8, %vm481_vm9 }
  0xc4   :  { %v477_v15 = vsub.f32 1.0, %v476_v62  ;;  %v458_v39 = vsel %vm1329_vm2, %v1339_v25, %v453_v63  ;;  %vm1441_vm13 = vmor %vm495_vm12, %vm496_vm10  ;;  %695 = vmatpush.msrb.mxu3 %v652_v8 }
  0xc5   :  { %v410_v55 = vpop.f32.mrf.mxu0  ;;  %v492_v20 = vsub.f32 1.0, %v491_v3  ;;  %vm485_vm14 = vcmp.eq.f32.partialorder %v484_v43, 8.507059e+37 }
  0xc6   :  { %v411_v57 = vadd.f32 %v410_v55, %v97_v45  ;;  %v424_v58 = vpop.f32.mrf.mxu1  ;;  %v478_v38 = vmul.f32 %v1275_v50, %v477_v15  ;;  %v651_v15 = vld [vmem:[%s1584_s4 + $0x98] sm:$0xff] }
  0xc7   :  { %v425_v1 = vadd.f32 %v424_v58, %v98_v49  ;;  %v493_v46 = vmul.f32 %v1296_v61, %v492_v20  ;;  %v638_v58 = vld [vmem:[%s1584_s4 + $0x30] sm:$0xff]  ;;  %696 = vmatpush.msrb.mxu3 %v651_v15 }
  0xc8   :  { %v1020_v4 = vmul.f32 -1.442695, %v411_v57  ;;  %v479_v37 = vadd.f32 %v1275_v50, %v478_v38  ;;  %673 = vmatpush.msrb.mxu2 %v638_v58  ;;  %v632_v38 = vld [vmem:[%s1584_s4] sm:$0xff] }
  0xc9   :  { %v1021_v9 = vmul.f32 -1.442695, %v425_v1  ;;  %v637_v1 = vld [vmem:[%s1584_s4 + $0x28] sm:$0xff]  ;;  %697 = vmatpush.msrb.mxu3 %v650_v24 }
  0xca   :  { %1097 = vpow2.f32 %v1020_v4  ;;  %674 = vmatpush.msrb.mxu2 %v637_v1 }
  0xcb   :  { %1099 = vpow2.f32 %v1021_v9  ;;  %698 = vmatpush.msrb.mxu3 %v649_v31 }
  0xcc   :  { %1101 = vtanh.f32 %v383_v10  ;;  %v483_v10 = vsel %vm1420_vm11, %v1275_v50, %v479_v37  ;;  %v635_v50 = vld [vmem:[%s1584_s4 + $0x18] sm:$0xff]  ;;  %675 = vmatpush.msrb.mxu2 %v636_v7 }
  0xcd   :  { %v412_v30 = vpop.f32.mrf.mxu0  ;;  %1103 = vtanh.f32 %v397_v16  ;;  %v488_v22 = vsel %vm485_vm14, %v487_v13, %v483_v10 }
  0xce   :  { %v413_v32 = vadd.f32 %v412_v30, %v97_v45  ;;  %v426_v33 = vpop.f32.mrf.mxu1  ;;  %v399_v45 = vadd.f32 %v398_v29, %v96_v0  ;;  %1105 = vtanh.f32 %v385_v28  ;;  %v494_v0 = vadd.f32 %v1296_v61, %v493_v46  ;;  %676 = vmatpush.msrb.mxu2 %v635_v50  ;;  %v633_v30 = vld [vmem:[%s1584_s4 + $0x8] sm:$0xff] }
  0xcf   :  { %v427_v40 = vadd.f32 %v426_v33, %v98_v49  ;;  %v464_v49 = vadd.f32 %v1265_v44, %v463_v26 }
  0xd0   :  { %v1022_v47 = vmul.f32 -1.442695, %v413_v32  ;;  %v1098_v52 = vpop.eup %1097  ;;  %v498_v14 = vsel %vm1441_vm13, %v1296_v61, %v494_v0  ;;  %677 = vmatpush.msrb.mxu2 %v634_v23 }
  0xd1   :  { %v1023_v54 = vmul.f32 -1.442695, %v427_v40  ;;  %v1100_v55 = vpop.eup %1099  ;;  %v1387_v57 = vadd.f32 1.0, %v1098_v52  ;;  %v468_v4 = vsel %vm1381_vm7, %v1265_v44, %v464_v49  ;;  %v499_v44 = vand.u32 2147483647, %v1260_v41  ;;  %v648_v40 = vld [vmem:[%s1584_s4 + $0x80] sm:$0xff] }
  0xd2   :  { %1107 = vpow2.f32 %v1022_v47  ;;  %v1397_v60 = vadd.f32 1.0, %v1100_v55  ;;  %v1102_v62 = vpop.eup %1101  ;;  %v473_v12 = vsel %vm1344_vm4, %v472_v53, %v468_v4  ;;  %678 = vmatpush.msrb.mxu2 %v633_v30  ;;  %699 = vmatpush.msrb.mxu3 %v648_v40 }
  0xd3   :  { %1109 = vpow2.f32 %v1023_v54  ;;  %v1104_v3 = vpop.eup %1103  ;;  %v585_v21 = vmul.f32 %v1102_v62, %v458_v39  ;;  %vm500_vm15 = vcmp.eq.f32.partialorder %v499_v44, 8.507059e+37  ;;  %v534_v42 = vand.u32 2147483647, %v1387_v57 }
  0xd4   :  { %1111 = vtanh.f32 %v399_v45  ;;  %v1106_v9 = vpop.eup %1105  ;;  %v586_v26 = vmul.f32 %v1104_v3, %v473_v12  ;;  %v503_v27 = vsel %vm500_vm15, %v502_v17, %v498_v14  ;;  %v536_v47 = vand.u32 2147483648, %v1387_v57  ;;  %679 = vmatpush.msrb.mxu2 %v632_v38 }
  0xd5   :  { %1113 = vrcp.f32 %v1387_v57  ;;  %v587_v32 = vmul.f32 %v1106_v9, %v488_v22  ;;  %v549_v48 = vand.u32 2147483647, %v1397_v60  ;;  %v551_v19 = vand.u32 2147483648, %v1397_v60 }
  0xd6   :  { %1115 = vrcp.f32 %v1397_v60  ;;  %vm530_vm2 = vweird.f32 %v1387_v57  ;;  %vm1505_vm4 = vcmp.eq.f32.partialorder %v534_v42, 8.507059e+37  ;;  %vm545_vm5 = vweird.f32 %v1397_v60 }
  0xd7   :  { %v537_v37 = vor.u32 1.1754944e-38, %v536_v47  ;;  %vm1521_vm7 = vcmp.eq.f32.partialorder %v549_v48, 8.507059e+37  ;;  %v552_v2 = vor.u32 1.1754944e-38, %v551_v19 }
  0xd8   :  { %v1108_v11 = vpop.eup %1107 }
  0xd9   :  { %v1110_v16 = vpop.eup %1109  ;;  %v1456_v18 = vadd.f32 1.0, %v1108_v11 }
  0xda   :  { %v1112_v20 = vpop.eup %1111  ;;  %v1458_v61 = vadd.f32 1.0, %v1110_v16 }
  0xdb   :  { %v1466_v25 = vpop.eup %1113  ;;  %1117 = vrcp.f32 %v1456_v18  ;;  %v588_v34 = vmul.f32 %v1112_v20, %v503_v27  ;;  %v566_v3 = vand.u32 2147483648, %v1456_v18  ;;  %v564_v5 = vand.u32 2147483647, %v1456_v18 }
  0xdc   :  { %v1469_v28 = vpop.eup %1115  ;;  %v526_v29 = vmul.f32 %v1466_v25, %v1387_v57  ;;  %1119 = vrcp.f32 %v1458_v61  ;;  %vm531_vm0 = vweird.f32 %v1466_v25  ;;  %v581_v6 = vand.u32 2147483648, %v1458_v61 }
  0xdd   :  { %v541_v33 = vmul.f32 %v1469_v28, %v1397_v60  ;;  %1121 = vtanh.f32 %v585_v21  ;;  %vm546_vm1 = vweird.f32 %v1469_v28  ;;  %vm1501_vm3 = vmor %vm530_vm2, %vm531_vm0  ;;  %v579_v8 = vand.u32 2147483647, %v1458_v61 }
  0xde   :  { %v527_v35 = vsub.f32 1.0, %v526_v29  ;;  %1123 = vtanh.f32 %v586_v26  ;;  %vm1517_vm6 = vmor %vm545_vm5, %vm546_vm1  ;;  %vm560_vm10 = vweird.f32 %v1456_v18  ;;  %v567_v11 = vor.u32 1.1754944e-38, %v566_v3 }
  0xdf   :  { %v542_v45 = vsub.f32 1.0, %v541_v33  ;;  %1125 = vtanh.f32 %v587_v32  ;;  %vm575_vm12 = vweird.f32 %v1458_v61  ;;  %vm565_vm13 = vcmp.eq.f32.partialorder %v564_v5, 8.507059e+37 }
  0xe0   :  { %v528_v46 = vmul.f32 %v1466_v25, %v527_v35  ;;  %1127 = vtanh.f32 %v588_v34  ;;  %v582_v14 = vor.u32 1.1754944e-38, %v581_v6  ;;  %vm580_vm15 = vcmp.eq.f32.partialorder %v579_v8, 8.507059e+37  ;;  %v744_v8 = vld [vmem:[%s1585_s5 + $0x8] sm:$0xff] }
  0xe1   :  { %v1118_v51 = vpop.eup %1117  ;;  %v543_v52 = vmul.f32 %v1469_v28, %v542_v45  ;;  %vm629_vm0 = vcmask 1040384   ;;  %784 = vmatpush.msra.mxu3 %v744_v8  ;;  %vm745_vm5 = vcmask 64512  }
  0xe2   :  { %v1120_v49 = vpop.eup %1119  ;;  %v529_v53 = vadd.f32 %v1466_v25, %v528_v46  ;;  %v556_v54 = vmul.f32 %v1118_v51, %v1456_v18  ;;  %vm561_vm8 = vweird.f32 %v1118_v51 }
  0xe3   :  { %v544_v36 = vadd.f32 %v1469_v28, %v543_v52  ;;  %v571_v58 = vmul.f32 %v1120_v49, %v1458_v61  ;;  %v1122_v59 = vpop.eup %1121  ;;  %vm576_vm9 = vweird.f32 %v1120_v49  ;;  %vm562_vm11 = vmor %vm560_vm10, %vm561_vm8 }
  0xe4   :  { %v533_v57 = vsel %vm1501_vm3, %v1466_v25, %v529_v53  ;;  %v557_v0 = vsub.f32 1.0, %v556_v54  ;;  %v1124_v60 = vpop.eup %1123  ;;  %vm577_vm14 = vmor %vm575_vm12, %vm576_vm9 }
  0xe5   :  { %v548_v1 = vsel %vm1517_vm6, %v1469_v28, %v544_v36  ;;  %v572_v4 = vsub.f32 1.0, %v571_v58  ;;  %v1126_v44 = vpop.eup %1125  ;;  %v538_v9 = vsel %vm1505_vm4, %v537_v37, %v533_v57  ;;  %v1188_v37 = vmov 512.0  }
  0xe6   :  { %v558_v43 = vmul.f32 %v1118_v51, %v557_v0  ;;  %v1128_v39 = vpop.eup %1127  ;;  %v553_v41 = vsel %vm1521_vm7, %v552_v2, %v548_v1  ;;  %v1538_v50 = vmul.f32 %v1122_v59, %v538_v9  ;;  %1129 = vrcp.f32 %v1188_v37 }
  0xe7   :  { %v573_v7 = vmul.f32 %v1120_v49, %v572_v4  ;;  %v1540_v17 = vmul.f32 %v1124_v60, %v553_v41 }
  0xe8   :  { %v559_v10 = vadd.f32 %v1118_v51, %v558_v43  ;;  %v611_v61 = vmul.f32 %v1538_v50, %v1538_v50 }
  0xe9   :  { %v574_v12 = vadd.f32 %v1120_v49, %v573_v7  ;;  %v612_v25 = vmul.f32 %v1540_v17, %v1540_v17  ;;  %v743_v7 = vld [vmem:[%s1585_s5] sm:$0xff] }
  0xea   :  { %v563_v13 = vsel %vm562_vm11, %v1118_v51, %v559_v10  ;;  %764 = vmatpush.msra.mxu2 %v743_v7 }
  0xeb   :  { %v578_v15 = vsel %vm577_vm14, %v1120_v49, %v574_v12  ;;  %v568_v16 = vsel %vm565_vm13, %v567_v11, %v563_v13  ;;  %v728_v13 = vld [vmem:[%s1583_s3] sm:$0x1] }
  0xec   :  { %v1542_v18 = vmul.f32 %v1126_v44, %v568_v16  ;;  %v583_v20 = vsel %vm580_vm15, %v582_v14, %v578_v15  ;;  %v1130_v62 = vpop.eup %1129  ;;  %v730_v15 = vrot.slane %v728_v13, 7 }
  0xed   :  { %v1544_v21 = vmul.f32 %v1128_v39, %v583_v20  ;;  %v705_v63 = vmul.f32 512.0, %v1130_v62  ;;  %vm709_vm1 = vweird.f32 %v1130_v62 }
  0xee   :  { %v597_v22 = vadd.f32 %v1542_v18, %v1538_v50  ;;  %v613_v23 = vmul.f32 %v1542_v18, %v1542_v18 }
  0xef   :  { %v604_v24 = vadd.f32 %v1544_v21, %v1540_v17  ;;  %v614_v26 = vmul.f32 %v1544_v21, %v1544_v21  ;;  %v706_v0 = vsub.f32 1.0, %v705_v63 }
  0xf0   :  { %v598_v27 = vrot.slane %v597_v22, 4  ;;  %v615_v28 = vadd.f32 %v613_v23, %v611_v61  ;;  %v733_v23 = vld [vmem:[%s1583_s3 + $0x1] sm:$0x1]  ;;  %s1189_s3 = smov [#allocation5]  }
  0xf1   :  { %v605_v29 = vrot.slane %v604_v24, 4  ;;  %v622_v30 = vadd.f32 %v614_v26, %v612_v25  ;;  %v707_v60 = vmul.f32 %v1130_v62, %v706_v0  ;;  %s809_s23 = sshll.u32 %s1189_s3, 4  ;;  %s810_s23 = int_to_ptr.vmem [resolvable:$true] %s809_s23 }
  0xf2   :  { %v599_v31 = vadd.f32 %v598_v27, %v597_v22  ;;  %v616_v32 = vrot.slane %v615_v28, 4 }
  0xf3   :  { %v606_v33 = vadd.f32 %v605_v29, %v604_v24  ;;  %v623_v34 = vrot.slane %v622_v30, 4  ;;  %v708_v1 = vadd.f32 %v1130_v62, %v707_v60 }
  0xf4   :  { %v600_v35 = vrot.slane %v599_v31, 2  ;;  %v617_v38 = vadd.f32 %v616_v32, %v615_v28 }
  0xf5   :  { %v607_v40 = vrot.slane %v606_v33, 2  ;;  %v624_v42 = vadd.f32 %v623_v34, %v622_v30  ;;  %v710_v4 = vsel %vm709_vm1, %v1130_v62, %v708_v1 }
  0xf6   :  { %v601_v45 = vadd.f32 %v600_v35, %v599_v31  ;;  %v618_v46 = vrot.slane %v617_v38, 2 }
  0xf7   :  { %v608_v47 = vadd.f32 %v607_v40, %v606_v33  ;;  %v625_v48 = vrot.slane %v624_v42, 2 }
  0xf8   :  { %v602_v51 = vrot.slane %v601_v45, 1  ;;  %v619_v52 = vadd.f32 %v618_v46, %v617_v38 }
  0xf9   :  { %v609_v19 = vrot.slane %v608_v47, 1  ;;  %v626_v49 = vadd.f32 %v625_v48, %v624_v42 }
  0xfa   :  { %v620_v53 = vrot.slane %v619_v52, 1  ;;  %v603_v55 = vadd.f32 %v602_v51, %v601_v45 }
  0xfb   :  { %v627_v54 = vrot.slane %v626_v49, 1  ;;  %v610_v36 = vadd.f32 %v609_v19, %v608_v47 }
  0xfc   :  { %v621_v56 = vadd.f32 %v620_v53, %v619_v52 }
  0xfd   :  { %v628_v58 = vadd.f32 %v627_v54, %v626_v49 }
  0xfe   :  { %v630_v59 = vsel %vm629_vm0, %v603_v55, %v621_v56 }
  0xff   :  { %680 = vmatmul.f32.vlgmr.msrb.gmra.mxu2 %v630_v59  ;;  %v631_v57 = vsel %vm629_vm0, %v610_v36, %v628_v58 }
 0x100   :  { %700 = vmatmul.f32.vlgmr.msrb.gmra.mxu3 %v631_v57 }
 0x182   :  { %v681_v2 = vpop.f32.mrf.mxu2 }
 0x183   :  { %v701_v3 = vpop.f32.mrf.mxu3 }
 0x184   :  { %v702_v43 = vadd.f32 %v701_v3, %v681_v2 }
 0x186   :  { %v711_v5 = vmul.f32 %v710_v4, %v702_v43 }
 0x188   :  { %v712_v6 = vmul.f32 %v711_v5, %v711_v5 }
 0x18a   :  { %v714_v44 = vrot.slane %v712_v6, 7 }
 0x18c   :  { %v716_v9 = vsub.f32 %v711_v5, %v714_v44 }
 0x18e   :  { %v717_v39 = vadd.f32 1e-05, %v716_v9 }
 0x190   :  { %1131 = vrsqrt.f32 %v717_v39  ;;  %vm724_vm3 = vweird.f32 %v717_v39 }
 0x196   :  { %v1132_v10 = vpop.eup %1131 }
 0x197   :  { %v719_v41 = vmul.f32 %v1132_v10, %v717_v39  ;;  %vm725_vm2 = vweird.f32 %v1132_v10 }
 0x198   :  { %vm726_vm4 = vmor %vm724_vm3, %vm725_vm2 }
 0x199   :  { %v720_v11 = vmul.f32 %v1132_v10, %v719_v41 }
 0x19b   :  { %v721_v12 = vmul.f32 0.5, %v720_v11 }
 0x19d   :  { %v722_v14 = vsub.f32 1.5, %v721_v12 }
 0x19f   :  { %v723_v16 = vmul.f32 %v1132_v10, %v722_v14 }
 0x1a1   :  { %v727_v20 = vsel %vm726_vm4, %v1132_v10, %v723_v16 }
 0x1a2   :  { %v732_v22 = vmul.f32 %v730_v15, %v727_v20 }
 0x1a4   :  { %v735_v61 = vrot.slane %v732_v22, 1 }
 0x1a6   :  { %v737_v24 = vmul.f32 %v735_v61, %v711_v5 }
 0x1a8   :  { %v738_v25 = vsub.f32 %v733_v23, %v737_v24 }
 0x1aa   :  { %v740_v26 = vrot.slane %v738_v25, 7 }
 0x1ac   :  { %v742_v27 = vsel %vm629_vm0, %v735_v61, %v740_v26 }
 0x1ad   :  { %1024 = vmatmul.msk.f32.vlgmr.msra.gmra.mxu2 %vm745_vm5, %v742_v27  ;;  %1025 = vmatmul.msk.f32.vlgmr.msra.gmra.mxu3 %vm745_vm5, %v742_v27 }
 0x230   :  { %v766_v28 = vpop.f32.mrf.mxu2  ;;  %v786_v29 = vpop.f32.mrf.mxu3 }
 0x231   :  { %v789_v30 = vperm.slane %v766_v28, 0  ;;  %v790_v31 = vperm.slane %v786_v29, 0  ;;  %v795_v32 = vperm.slane %v766_v28, 1  ;;  %v796_v33 = vperm.slane %v786_v29, 1 }
 0x233   :  { %v791_v34 = vmul.f32 %v789_v30, %v1538_v50  ;;  %v793_v35 = vmul.f32 %v789_v30, %v1542_v18  ;;  %v792_v38 = vmul.f32 %v790_v31, %v1540_v17  ;;  %v794_v40 = vmul.f32 %v790_v31, %v1544_v21 }
 0x235   :  { %v797_v42 = vadd.f32 %v795_v32, %v791_v34  ;;  %v799_v45 = vadd.f32 %v795_v32, %v793_v35  ;;  %v798_v46 = vadd.f32 %v796_v33, %v792_v38  ;;  %v800_v47 = vadd.f32 %v796_v33, %v794_v40 }
 0x237   :  { %801 = vst [vmem:[#allocation5] sm:$0xff] %v797_v42 }
 0x238   :  { %803 = vst [vmem:[#allocation5 + $0x10] sm:$0xff] %v799_v45 }
 0x239   :  { %802 = vst [vmem:[#allocation5 + $0x8] sm:$0xff] %v798_v46 }
 0x23a   :  { %804 = vst [vmem:[#allocation5 + $0x18] sm:$0xff] %v800_v47 }
 0x23b   :  { %817 = dma.vmem_to_hbm [thread:$0]  %s810_s23, 512, %s812_s26, [#allocation4], %s1190_s27, %s1190_s27, %s1191_s1  }
 0x23c   :  { %1183 = dma.done.wait [#allocation4], 512  }
 0x23d   :  { %1184 = vsyncadd [#allocation4], 4294966784 }
 0x23e   :  { %822 = vsyncpa [#allocation3], 1 }
 0x23f   :  { %823 = vsyncpa [#allocation4], 1 }

</bundles_post_ra>
